<compile_context>
chip_gen: v7x
topology: tpu7x:2x2x1
jax: 0.10.0
libtpu: 0.0.40
codegen_flags: <defaults>
</compile_context>

<pallas_src>
import functools

import jax
import jax.numpy as jnp
from jax.experimental import pallas as pl
from jax.experimental.pallas import tpu as pltpu


_SUBLANE = 8                       # f32 sublane tile height
_LANES = 128                       # lane width
_NUM_LOSS_SHARDS = 2               # v7x: 2 TensorCores; extra outer axis is harmless on v5e/v6e
_VMEM_X_BUDGET_BYTES = 24 << 20    # budget for the double-buffered x stream (fits v7x 64 MiB VMEM)
_MAX_TILE_ROWS = 32768
_VMEM_LIMIT_CAP = 48 << 20

# "NT" dims: contract last dim of both operands (A @ B.T), like q @ k.T in flash attention.
_NT_DIMS = (((1,), (1,)), ((), ()))


def _cdiv(a, b):
    return -(-a // b)


def _round_up(a, b):
    return _cdiv(a, b) * b


def _pick_tile_rows(rows_needed, lane_width):
    """Largest VMEM-budget-aware row tile (multiple of 128 output lanes)."""
    row_bytes = _round_up(lane_width, _LANES) * 4            # f32, lane-padded VMEM layout
    max_rows = _VMEM_X_BUDGET_BYTES // (2 * row_bytes)       # 2x: double buffering
    max_rows = max(_LANES, min(_MAX_TILE_ROWS, (max_rows // _LANES) * _LANES))
    return min(max_rows, _round_up(rows_needed, _LANES))


def _vmem_limit_bytes(tile_rows, lane_width):
    row_bytes = _round_up(lane_width, _LANES) * 4
    x_bytes = 2 * tile_rows * row_bytes                      # double-buffered x stream
    aux_bytes = 2 * _SUBLANE * tile_rows * 4                 # out / y stream (sublane padded)
    w_bytes = 2 * _SUBLANE * row_bytes + (1 << 16)           # resident weights + misc scratch
    total = x_bytes + aux_bytes + w_bytes
    return int(min(max(total + total // 4, 16 << 20), _VMEM_LIMIT_CAP))


def _logits(x_ref, w_ref, b_ref, fold):
    """z[j, r] = logit of batch element r*fold + j, as a lane-dense (fold, TILE_ROWS) slab."""
    # w_ref is (8, fold*D): rows 0..fold-1 hold the block-diagonal fused weights, the
    # remaining rows are zero padding so the MXU LHS is a full f32 sublane tile.
    z8 = jax.lax.dot_general(w_ref[...], x_ref[...], _NT_DIMS,
                             preferred_element_type=jnp.float32)   # (8, TILE_ROWS)
    return z8[0:fold, :] + b_ref[0, 0]                             # (fold, TILE_ROWS)


def _pred_kernel(x_ref, w_ref, b_ref, o_ref, *, fold):
    o_ref[...] = jax.nn.sigmoid(_logits(x_ref, w_ref, b_ref, fold))


def _loss_kernel(x_ref, w_ref, b_ref, y_ref, loss_ref, *, fold, tile_rows, steps, n_true):
    c = pl.program_id(0)   # core shard ("parallel")
    s = pl.program_id(1)   # batch-tile step within the shard ("arbitrary", accumulates)

    @pl.when(s == 0)
    def _init():
        loss_ref[...] = jnp.zeros_like(loss_ref)

    z = _logits(x_ref, w_ref, b_ref, fold)          # (fold, tile_rows)
    y = y_ref[...]

    # Stable BCE on logits, reproducing nn.BCELoss' log clamp at -100:
    #   log(sigmoid(z)) = -softplus(-z),  log(1 - sigmoid(z)) = -softplus(z)
    t = jnp.log1p(jnp.exp(-jnp.abs(z)))
    log_p = jnp.maximum(-(jnp.maximum(-z, 0.0) + t), -100.0)
    log_1mp = jnp.maximum(-(jnp.maximum(z, 0.0) + t), -100.0)
    per = -(y * log_p + (1.0 - y) * log_1mp)

    # Mask batch padding appended by the wrapper (element [j, r] is batch index r*fold + j).
    start_row = (c * steps + s) * tile_rows
    row = start_row + jax.lax.broadcasted_iota(jnp.int32, per.shape, 1)
    sub = jax.lax.broadcasted_iota(jnp.int32, per.shape, 0)
    per = jnp.where(row * fold + sub < n_true, per, 0.0)

    # Sublane reduce then lane reduce; XLU has plenty of slack in this HBM-bound kernel.
    loss_ref[...] += jnp.sum(jnp.sum(per, axis=0, keepdims=True), axis=1, keepdims=True)


def _fold_input(x, batch, d, fold, padded_rows):
    padded_b = padded_rows * fold
    if padded_b != batch:
        x = jnp.pad(x, ((0, padded_b - batch), (0, 0)))
    # Row-major reshape packs `fold` consecutive batch rows into one lane-dense row.
    return x.reshape(padded_rows, fold * d)


def torch_model_forward(x, params, y=None):
    """Replicates TorchModel.forward: y_pred, or mean BCE loss if y is given."""
    w1, b1, w2, b2 = params
    batch, d = x.shape
    x = x.astype(jnp.float32)

    # Algebraic fusion of linear1 -> linear2.  Valid ONLY because TorchModel applies no
    # nonlinearity between the two linear layers; revisit if an activation is inserted.
    w_eff = (w1 @ w2).reshape(1, d)                # [1, D]
    b_eff = (b1 @ w2 + b2).reshape(1, 1)           # [1, 1] scalar -> SMEM

    # Lane-dense folding factor: pack `fold` batch rows into one 128-lane row when possible.
    fold = _LANES // d if (d < _LANES and _LANES % d == 0) else 1
    dl = fold * d                                  # folded row width (128 when folding)

    # Block-diagonal weight LHS, zero-padded to a full 8-sublane tile.
    w_lhs = jnp.kron(jnp.eye(fold, dtype=jnp.float32), w_eff)     # [fold, dl]
    w_lhs = jnp.pad(w_lhs, ((0, _SUBLANE - fold), (0, 0)))        # [8, dl]

    rows_needed = _cdiv(batch, fold)
    tile_cap = _pick_tile_rows(rows_needed, dl)

    w_spec_shape = (_SUBLANE, dl)
    b_spec = pl.BlockSpec(memory_space=pltpu.MemorySpace.SMEM)

    if y is None:
        rows_min = _round_up(rows_needed, _LANES)
        n_tiles = _cdiv(rows_min, tile_cap)
        tile_rows = _round_up(_cdiv(rows_min, n_tiles), _LANES)   # minimize padding
        padded_rows = n_tiles * tile_rows
        x_fold = _fold_input(x, batch, d, fold, padded_rows)

        out = pl.pallas_call(
            functools.partial(_pred_kernel, fold=fold),
            out_shape=jax.ShapeDtypeStruct((fold, padded_rows), jnp.float32),
            grid=(n_tiles,),
            in_specs=[pl.BlockSpec((tile_rows, dl), lambda i: (i, 0)),     # streamed x tiles
                      pl.BlockSpec(w_spec_shape, lambda i: (0, 0)),        # resident weights
                      b_spec],                                             # scalar bias (SMEM)
            out_specs=pl.BlockSpec((fold, tile_rows), lambda i: (0, i)),   # lane-dense output
            compiler_params=pltpu.CompilerParams(
                dimension_semantics=("parallel",),
                vmem_limit_bytes=_vmem_limit_bytes(tile_rows, dl)),
        )(x_fold, w_lhs, b_eff)
        # out[j, r] is the prediction for batch element r*fold + j.
        return out.T.reshape(-1, 1)[:batch]

    # ---------------- training path: fused forward + mean BCE ----------------
    rows_per_core = _round_up(_cdiv(rows_needed, _NUM_LOSS_SHARDS), _LANES)
    steps = _cdiv(rows_per_core, tile_cap)
    tile_rows = _round_up(_cdiv(rows_per_core, steps), _LANES)    # minimize padding
    padded_rows = _NUM_LOSS_SHARDS * steps * tile_rows
    padded_b = padded_rows * fold

    x_fold = _fold_input(x, batch, d, fold, padded_rows)
    y_pad = y.astype(jnp.float32).reshape(batch, 1)
    if padded_b != batch:
        y_pad = jnp.pad(y_pad, ((0, padded_b - batch), (0, 0)))
    y_fold = y_pad.reshape(padded_rows, fold).T                   # [fold, padded_rows]

    partials = pl.pallas_call(
        functools.partial(_loss_kernel, fold=fold, tile_rows=tile_rows,
                          steps=steps, n_true=batch),
        out_shape=jax.ShapeDtypeStruct((_NUM_LOSS_SHARDS, 1), jnp.float32),
        grid=(_NUM_LOSS_SHARDS, steps),
        in_specs=[pl.BlockSpec((tile_rows, dl), lambda c, s: (c * steps + s, 0)),
                  pl.BlockSpec(w_spec_shape, lambda c, s: (0, 0)),
                  b_spec,
                  pl.BlockSpec((fold, tile_rows), lambda c, s: (0, c * steps + s))],
        out_specs=pl.BlockSpec((1, 1), lambda c, s: (c, 0)),      # per-core resident partial
        compiler_params=pltpu.CompilerParams(
            dimension_semantics=("parallel", "arbitrary"),
            vmem_limit_bytes=_vmem_limit_bytes(tile_rows, dl)),
    )(x_fold, w_lhs, b_eff, y_fold)
    return jnp.sum(partials) / batch


def init_params(key, input_size, hidden=16):
    """Deterministic init mimicking nn.Linear's U(-1/sqrt(fan_in), 1/sqrt(fan_in))."""
    k1, k2, k3, k4 = jax.random.split(key, 4)
    lim1 = 1.0 / jnp.sqrt(jnp.float32(input_size))
    lim2 = 1.0 / jnp.sqrt(jnp.float32(hidden))
    w1 = jax.random.uniform(k1, (input_size, hidden), jnp.float32, -lim1, lim1)
    b1 = jax.random.uniform(k2, (1, hidden), jnp.float32, -lim1, lim1)
    w2 = jax.random.uniform(k3, (hidden, 1), jnp.float32, -lim2, lim2)
    b2 = jax.random.uniform(k4, (1, 1), jnp.float32, -lim2, lim2)
    return w1, b1, w2, b2


if __name__ == "__main__":
    key = jax.random.PRNGKey(0)
    kx, ky, kp = jax.random.split(key, 3)

    batch, input_size = 8, 32
    x = jax.random.normal(kx, (batch, input_size), jnp.float32)
    y = (jax.random.uniform(ky, (batch, 1), jnp.float32) > 0.5).astype(jnp.float32)

    params = init_params(kp, input_size)

    y_pred = torch_model_forward(x, params)       # inference path
    loss = torch_model_forward(x, params, y)      # training path (scalar mean BCE)
    jax.block_until_ready((y_pred, loss))

    # Pure-JAX reference with PyTorch semantics (BCELoss clamps each log at -100).
    w1, b1, w2, b2 = params
    ref_pred = jax.nn.sigmoid((x @ w1 + b1) @ w2 + b2)
    logp = jnp.maximum(jnp.log(ref_pred), -100.0)
    log1mp = jnp.maximum(jnp.log(1.0 - ref_pred), -100.0)
    ref_loss = -jnp.mean(y * logp + (1.0 - y) * log1mp)

    assert y_pred.shape == (batch, 1)
    assert jnp.allclose(y_pred, ref_pred, atol=1e-5), "prediction mismatch"
    assert jnp.allclose(loss, ref_loss, atol=1e-5), "loss mismatch"

    print("KERNEL_OK")
</pallas_src>

<mosaic_0001>
module attributes {stable_mosaic.version = 11 : i64} {
  func.func @_pred_kernel(%arg0: i32, %arg1: memref<128x128xf32, #tpu.memory_space<vmem>>, %arg2: memref<8x128xf32, #tpu.memory_space<vmem>>, %arg3: memref<1x1xf32, #tpu.memory_space<smem>>, %arg4: memref<4x128xf32, #tpu.memory_space<vmem>>) attributes {dimension_semantics = [#tpu.dimension_semantics<parallel>], iteration_bounds = array<i64: 1>, scalar_prefetch = 0 : i64, scratch_operands = 0 : i64, tpu.core_type = #tpu.core_type<tc>, window_params = [{transform_indices = @transform_0, window_bounds = array<i64: 128, 128>}, {pipeline_mode = #tpu.pipeline_mode<synchronous>, transform_indices = @transform_1, window_bounds = array<i64: 8, 128>}, {transform_indices = @transform_2, window_bounds = array<i64: 1, 1>}, {transform_indices = @transform_3, window_bounds = array<i64: 4, 128>}]} {
    %c0 = arith.constant 0 : index
    %c0_0 = arith.constant 0 : index
    %0 = vector.load %arg2[%c0, %c0_0] : memref<8x128xf32, #tpu.memory_space<vmem>>, vector<8x128xf32>
    %c0_1 = arith.constant 0 : index
    %c0_2 = arith.constant 0 : index
    %1 = vector.load %arg1[%c0_1, %c0_2] : memref<128x128xf32, #tpu.memory_space<vmem>>, vector<128x128xf32>
    %cst = arith.constant dense<0.000000e+00> : vector<8x128xf32>
    %2 = tpu.matmul %0, %1, %cst {dimension_numbers = #tpu.dot_dimension_numbers<[1], [1], [0], [0], [0, 0, 1, 0], [], []>} : vector<8x128xf32>, vector<128x128xf32>, vector<8x128xf32> -> vector<8x128xf32>
    %3 = vector.extract_strided_slice %2 {offsets = [0, 0], sizes = [4, 128], strides = [1, 1]} : vector<8x128xf32> to vector<4x128xf32>
    %c0_3 = arith.constant 0 : index
    %c0_4 = arith.constant 0 : index
    %4 = memref.load %arg3[%c0_3, %c0_4] : memref<1x1xf32, #tpu.memory_space<smem>>
    %5 = vector.broadcast %4 : f32 to vector<4x128xf32>
    %6 = arith.addf %3, %5 : vector<4x128xf32>
    %7 = arith.negf %6 : vector<4x128xf32>
    %8 = math.exp %7 : vector<4x128xf32>
    %cst_5 = arith.constant 1.000000e+00 : f32
    %9 = vector.broadcast %cst_5 : f32 to vector<4x128xf32>
    %10 = arith.addf %9, %8 : vector<4x128xf32>
    %11 = arith.divf %9, %10 : vector<4x128xf32>
    %c0_6 = arith.constant 0 : index
    %c0_7 = arith.constant 0 : index
    %12 = vector.load %arg4[%c0_6, %c0_7] : memref<4x128xf32, #tpu.memory_space<vmem>>, vector<4x128xf32>
    tpu.vector_store %arg4[%c0_6, %c0_7], %11 {strides = array<i32>} : memref<4x128xf32, #tpu.memory_space<vmem>>, vector<4x128xf32>,
    return
  }
  func.func @transform_0(%arg0: i32) -> (i32, i32) {
    %c0_i32 = arith.constant 0 : i32
    %c0_i32_0 = arith.constant 0 : i32
    return %arg0, %c0_i32 : i32, i32
  }
  func.func @transform_1(%arg0: i32) -> (i32, i32) {
    %c0_i32 = arith.constant 0 : i32
    %c0_i32_0 = arith.constant 0 : i32
    %c0_i32_1 = arith.constant 0 : i32
    return %c0_i32, %c0_i32_0 : i32, i32
  }
  func.func @transform_2(%arg0: i32) -> (i32, i32) {
    %c0_i32 = arith.constant 0 : i32
    %c0_i32_0 = arith.constant 0 : i32
    %c0_i32_1 = arith.constant 0 : i32
    return %c0_i32, %c0_i32_0 : i32, i32
  }
  func.func @transform_3(%arg0: i32) -> (i32, i32) {
    %c0_i32 = arith.constant 0 : i32
    %c0_i32_0 = arith.constant 0 : i32
    return %c0_i32, %arg0 : i32, i32
  }
}

</mosaic_0001>

<bundles_post_ra>
// kernel: tpu_custom_call.1
= control target key start
LH: loop header
LB: loop body
LE: loop exit
PB: predicated region body
PF: predicated region fallthrough
CT: control target
= control target key end

     0   :  { %9 = vsyncpa [#allocation4], 0  ;;  %s383_s0 = inlined_call_operand.hbm [shape: f32[128,128], index: 0, kind: input, shape index: {}]   ;;  %s384_s1 = inlined_call_operand.hbm [shape: f32[8,128], index: 1, kind: input, shape index: {}]   ;;  %s385_s2 = inlined_call_operand.<no memory space> [shape: f32[1,1], index: 2, kind: input, shape index: {}]   ;;  %s386_s3 = inlined_call_operand.hbm [shape: f32[4,128], index: 3, kind: output, shape index: {}]  }
   0x1   :  { %10 = vsyncpa [#allocation7], 0 }
   0x2   :  { %11 = vsyncpa [#allocation5], 0  ;;  %s316_s12 = smov [#allocation3]   ;;  %s244_s16 = scalar_lea.hbm %s383_s0, 2048 }
   0x3   :  { %s17_s13 = sshll.u32 %s316_s12, 4  ;;  %p245_p0 = scmp.ne.s32.totalorder %s383_s0, %s244_s16  ;;  %s18_s13 = int_to_ptr.vmem [resolvable:$true] %s17_s13 }
   0x4   :  { %p248_p1 = scmp.lt.u32.totalorder %s244_s16, %s383_s0 }
   0x6   :  { %p250_p2 = pnand %p248_p1, %p245_p0 }
   0x8   :  { %253 = shalt.err (!%p250_p2)
}
   0x9   :  { %s254_s21 = scalar_lea.vmem %s18_s13, 2048  ;;  %p259_p4 = scmp.lt.s32.totalorder %s18_s13, %s18_s13 }
   0xa   :  { %p255_p3 = scmp.ne.s32.totalorder %s18_s13, %s254_s21  ;;  %p260_p5 = scmp.lt.s32.totalorder %s254_s21, %s254_s21 }
   0xc   :  { %p261_p6 = por %p260_p5, %p259_p4 }
   0xe   :  { %p262_p7 = pnand %p261_p6, %p255_p3 }
  0x10   :  { %265 = shalt.err (!%p262_p7)
}
  0x11   :  { %s317_s22 = smov 128   ;;  %s318_s23 = smov 8  }
  0x12   :  { %23 = dma.hbm_to_vmem [thread:$0]  %s383_s0, 2048, %s18_s13, [#allocation4], %s317_s22, %s317_s22, %s318_s23  }
  0x13   :  { %s319_s26 = smov [#allocation6]   ;;  %s266_s30 = scalar_lea.hbm %s384_s1, 128 }
  0x14   :  { %s30_s27 = sshll.u32 %s319_s26, 4  ;;  %p267_p8 = scmp.ne.s32.totalorder %s384_s1, %s266_s30  ;;  %s31_s27 = int_to_ptr.vmem [resolvable:$true] %s30_s27 }
  0x15   :  { %p270_p9 = scmp.lt.u32.totalorder %s266_s30, %s384_s1 }
  0x17   :  { %p272_p10 = pnand %p270_p9, %p267_p8 }
  0x19   :  { %275 = shalt.err (!%p272_p10)
}
  0x1a   :  { %s276_s8 = scalar_lea.vmem %s31_s27, 128  ;;  %p281_p12 = scmp.lt.s32.totalorder %s31_s27, %s31_s27 }
  0x1b   :  { %p277_p11 = scmp.ne.s32.totalorder %s31_s27, %s276_s8  ;;  %p282_p13 = scmp.lt.s32.totalorder %s276_s8, %s276_s8 }
  0x1d   :  { %p283_p0 = por %p282_p13, %p281_p12 }
  0x1f   :  { %p284_p1 = pnand %p283_p0, %p277_p11 }
  0x21   :  { %287 = shalt.err (!%p284_p1)
}
  0x22   :  { %33 = dma.hbm_to_vmem [thread:$0]  %s384_s1, 128, %s31_s27, [#allocation7]  }
  0x23   :  { %310 = dma.done.wait [#allocation4], 2048  }
  0x24   :  { %311 = vsyncadd [#allocation4], 4294965248 }
  0x25   :  { %312 = dma.done.wait [#allocation7], 128  }
  0x26   :  { %313 = vsyncadd [#allocation7], 4294967168  ;;  %v320_v0 = vmov 0.0|0.0   ;;  %vm321_vm0 = vmmov 0   ;;  %v322_v1 = vmov 0.0   ;;  %v43_v2 = vld [vmem:[#allocation3] sm:$0xff]  ;;  %v130_v27 = vstv %s385_s2 }
  0x27   :  { %208 = vmatprep.subr.bf16.mxu0 %v320_v0  ;;  %205 = vmatprep.mubr.msk.f32.mxu0 %vm321_vm0, %v322_v1  ;;  %v44_v3 = vld [vmem:[#allocation3 + $0x8] sm:$0xff]  ;;  %v45_v5 = vld [vmem:[#allocation3 + $0x10] sm:$0xff]  ;;  %v46_v6 = vld [vmem:[#allocation3 + $0x18] sm:$0xff]  ;;  %s323_s11 = smov [#allocation8]  }
  0x28   :  { %v209_v4 = vpack.c.bf16 %v44_v3, %v43_v2  ;;  %v212_v7 = vpack.c.bf16 %v46_v6, %v45_v5  ;;  %v47_v8 = vld [vmem:[#allocation3 + $0x20] sm:$0xff]  ;;  %v48_v9 = vld [vmem:[#allocation3 + $0x28] sm:$0xff]  ;;  %v49_v11 = vld [vmem:[#allocation3 + $0x30] sm:$0xff]  ;;  %s145_s12 = sshll.u32 %s323_s11, 4  ;;  %s146_s12 = int_to_ptr.vmem [resolvable:$true] %s145_s12 }
  0x29   :  { %v215_v10 = vpack.c.bf16 %v48_v9, %v47_v8  ;;  %v50_v12 = vld [vmem:[#allocation3 + $0x38] sm:$0xff]  ;;  %v51_v14 = vld [vmem:[#allocation3 + $0x40] sm:$0xff]  ;;  %v52_v15 = vld [vmem:[#allocation3 + $0x48] sm:$0xff]  ;;  %s288_s13 = scalar_lea.vmem %s146_s12, 64  ;;  %p293_p3 = scmp.lt.s32.totalorder %s146_s12, %s146_s12 }
  0x2a   :  { %210 = vmatpush3.bf16.xpose.msra.mxu0 %v209_v4  ;;  %v218_v13 = vpack.c.bf16 %v50_v12, %v49_v11  ;;  %v221_v16 = vpack.c.bf16 %v52_v15, %v51_v14  ;;  %v53_v17 = vld [vmem:[#allocation3 + $0x50] sm:$0xff]  ;;  %v54_v18 = vld [vmem:[#allocation3 + $0x58] sm:$0xff]  ;;  %v55_v20 = vld [vmem:[#allocation3 + $0x60] sm:$0xff]  ;;  %p289_p2 = scmp.ne.s32.totalorder %s146_s12, %s288_s13  ;;  %p294_p4 = scmp.lt.s32.totalorder %s288_s13, %s288_s13 }
  0x2b   :  { %211 = vmatprep.subr.bf16.mxu0 %v320_v0  ;;  %v224_v19 = vpack.c.bf16 %v54_v18, %v53_v17  ;;  %v56_v21 = vld [vmem:[#allocation3 + $0x68] sm:$0xff]  ;;  %v57_v23 = vld [vmem:[#allocation3 + $0x70] sm:$0xff]  ;;  %v58_v24 = vld [vmem:[#allocation3 + $0x78] sm:$0xff] }
  0x2c   :  { %v227_v22 = vpack.c.bf16 %v56_v21, %v55_v20  ;;  %v230_v25 = vpack.c.bf16 %v58_v24, %v57_v23  ;;  %v42_v26 = vld [vmem:[#allocation6] sm:$0xff]  ;;  %p295_p5 = por %p294_p4, %p293_p3 }
  0x2e   :  { %p296_p6 = pnand %p295_p5, %p289_p2 }
  0x32   :  { %213 = vmatpush3.bf16.xpose.msra.mxu0 %v212_v7 }
  0x33   :  { %214 = vmatprep.subr.bf16.mxu0 %v320_v0 }
  0x3a   :  { %216 = vmatpush3.bf16.xpose.msra.mxu0 %v215_v10 }
  0x3b   :  { %217 = vmatprep.subr.bf16.mxu0 %v320_v0 }
  0x42   :  { %219 = vmatpush3.bf16.xpose.msra.mxu0 %v218_v13 }
  0x43   :  { %220 = vmatprep.subr.bf16.mxu0 %v320_v0 }
  0x4a   :  { %222 = vmatpush3.bf16.xpose.msra.mxu0 %v221_v16 }
  0x4b   :  { %223 = vmatprep.subr.bf16.mxu0 %v320_v0 }
  0x52   :  { %225 = vmatpush3.bf16.xpose.msra.mxu0 %v224_v19 }
  0x53   :  { %226 = vmatprep.subr.bf16.mxu0 %v320_v0 }
  0x5a   :  { %228 = vmatpush3.bf16.xpose.msra.mxu0 %v227_v22 }
  0x5b   :  { %229 = vmatprep.subr.bf16.mxu0 %v320_v0 }
  0x62   :  { %231 = vmatpush3.bf16.xpose.msra.mxu0 %v230_v25 }
  0x69   :  { %206 = vmatmul.mubr.f32.vlgmr.msra.gmra.mrb[0].mxu0 %v42_v26 }
 0x13c   :  { %v125_v28 = vpop.f32.mrb[0].mxu0 }
 0x13d   :  { %v131_v29 = vadd.f32 %v130_v27, %v125_v28  ;;  %v207_v30 = vpop.f32.mrb[1].mxu0 }
 0x13f   :  { %v155_v31 = vmul.f32 -1.442695, %v131_v29 }
 0x141   :  { %240 = vpow2.f32 %v155_v31 }
 0x14b   :  { %v241_v32 = vpop.eup %240 }
 0x14c   :  { %v135_v33 = vadd.f32 1.0, %v241_v32 }
 0x14e   :  { %242 = vrcp.f32 %v135_v33 }
 0x158   :  { %v243_v34 = vpop.eup %242 }
 0x159   :  { %138 = vst [vmem:[#allocation8] sm:$0xf] %v243_v34 }
 0x15a   :  { %299 = shalt.err (!%p296_p6)
}
 0x15b   :  { %s300_s15 = scalar_lea.hbm %s386_s3, 64 }
 0x15c   :  { %p301_p7 = scmp.ne.s32.totalorder %s386_s3, %s300_s15  ;;  %p304_p8 = scmp.lt.u32.totalorder %s300_s15, %s386_s3 }
 0x15e   :  { %p306_p9 = pnand %p304_p8, %p301_p7 }
 0x160   :  { %309 = shalt.err (!%p306_p9)
}
 0x161   :  { %148 = dma.vmem_to_hbm [thread:$0]  %s146_s12, 64, %s386_s3, [#allocation5]  }
 0x162   :  { %314 = dma.done.wait [#allocation5], 64  }
 0x163   :  { %315 = vsyncadd [#allocation5], 4294967232 }
 0x164   :  { %152 = vsyncpa [#allocation4], 1 }
 0x165   :  { %153 = vsyncpa [#allocation7], 1 }
 0x166   :  { %154 = vsyncpa [#allocation5], 1 }

</bundles_post_ra>
